<compile_context>
chip_gen: v5e
topology: v5e:2x2
jax: 0.10.0
libtpu: 0.0.40
codegen_flags: <defaults>
</compile_context>

<pallas_src>
import functools

import jax
import jax.numpy as jnp
from jax.experimental import pallas as pl
from jax.experimental.pallas import tpu as pltpu

LANE = 128             # lane width
MAX_TILE_ROWS = 1024   # sublane rows per grid step (512 KiB f32 tile)
MAX_CHUNKS = 8         # outer ("parallel") grid axis; megacore-splittable on v7x
NEG_FILL = -1e4        # padding logit: all padded contributions are exactly 0


def _round_up(x, m):
    return (x + m - 1) // m * m


def _dice_focal_kernel(x_ref, t_ref, out_ref,
                       inter_acc, card_acc, tsum_acc, focal_acc,
                       *, alpha, gamma):
    i = pl.program_id(1)

    @pl.when(i == 0)
    def _():
        inter_acc[...] = jnp.zeros_like(inter_acc)
        card_acc[...] = jnp.zeros_like(card_acc)
        tsum_acc[...] = jnp.zeros_like(tsum_acc)
        focal_acc[...] = jnp.zeros_like(focal_acc)

    x = x_ref[...].astype(jnp.float32)
    t = t_ref[...].astype(jnp.float32)

    # ---- soft-dice partial terms: elementwise accumulate, reduce at the end ----
    p = jax.nn.sigmoid(x)
    inter_acc[...] += p * t          # sum(p * t)
    card_acc[...] += p + t           # sum(p + t)
    tsum_acc[...] += t               # sum(t)   (for the "target present" gate)

    # ---- binary focal-with-logits partial term ----
    # Stable BCE-with-logits: max(x,0) - x*t + log1p(exp(-|x|))
    logpt = jnp.maximum(x, 0.0) - x * t + jnp.log1p(jnp.exp(-jnp.abs(x)))
    # For binary targets exp(-logpt) == t*p + (1-t)*(1-p); use the cheap VPU form
    # (also avoids the pt > 1 rounding -> NaN-in-pow issue).
    pt = t * p + (1.0 - t) * (1.0 - p)
    one_minus_pt = jnp.maximum(1.0 - pt, 0.0)
    if gamma == 2.0:
        focal_term = one_minus_pt * one_minus_pt
    elif gamma == 1.0:
        focal_term = one_minus_pt
    else:
        focal_term = jnp.power(one_minus_pt, gamma)
    alpha_w = alpha * t + (1.0 - alpha) * (1.0 - t)
    focal_acc[...] += focal_term * logpt * alpha_w

    # ---- finalize this chunk: one cross-lane reduce per accumulator ----
    @pl.when(i == pl.num_programs(1) - 1)
    def _():
        out_ref[0, 0] = jnp.sum(inter_acc[...])
        out_ref[0, 1] = jnp.sum(card_acc[...])
        out_ref[0, 2] = jnp.sum(tsum_acc[...])
        out_ref[0, 3] = jnp.sum(focal_acc[...])


def dice_focal_loss(inputs, targets, alpha=0.25, gamma=2.0, *,
                    max_tile_rows=MAX_TILE_ROWS, max_chunks=MAX_CHUNKS):
    """inputs: (N, C, H, W) logits, targets: (N, C, H, W) binary labels."""
    n = inputs.size
    x = inputs.reshape(-1)                        # keep native dtype
    t = targets.reshape(-1).astype(jnp.bfloat16)  # 0/1 exact in bf16, half the bytes

    rows = pl.cdiv(n, LANE)
    tile_rows = min(max_tile_rows, _round_up(rows, 8))
    total_tiles = pl.cdiv(rows, tile_rows)
    num_chunks = min(max_chunks, total_tiles)
    tiles_per_chunk = pl.cdiv(total_tiles, num_chunks)
    num_chunks = pl.cdiv(total_tiles, tiles_per_chunk)    # trim empty chunks

    padded_rows = num_chunks * tiles_per_chunk * tile_rows
    pad = padded_rows * LANE - n
    # Pad logits very negative and targets with 0: sigmoid/exp/log1p underflow
    # to 0 so every padded element contributes exactly zero to all four sums;
    # no mask stream and no in-kernel masking needed.
    x = jnp.pad(x, (0, pad), constant_values=NEG_FILL).reshape(-1, LANE)
    t = jnp.pad(t, (0, pad), constant_values=0).reshape(-1, LANE)

    kernel = functools.partial(_dice_focal_kernel,
                               alpha=float(alpha), gamma=float(gamma))

    tile_spec = pl.BlockSpec(
        (tile_rows, LANE), lambda c, i: (c * tiles_per_chunk + i, 0))

    partials = pl.pallas_call(
        kernel,
        out_shape=jax.ShapeDtypeStruct((num_chunks, 4), jnp.float32),
        grid_spec=pltpu.PrefetchScalarGridSpec(
            num_scalar_prefetch=0,
            grid=(num_chunks, tiles_per_chunk),
            in_specs=[tile_spec, tile_spec],
            out_specs=pl.BlockSpec((1, 4), lambda c, i: (c, 0),
                                   memory_space=pltpu.SMEM),
            scratch_shapes=[pltpu.VMEM((tile_rows, LANE), jnp.float32)] * 4,
        ),
        compiler_params=pltpu.CompilerParams(
            dimension_semantics=("parallel", "arbitrary")),
    )(x, t)

    # Trivial scalar combine (lives in the wrapper per perf review).
    sums = jnp.sum(partials, axis=0)
    inter, card, tsum, fsum = sums[0], sums[1], sums[2], sums[3]
    score = 2.0 * inter / jnp.maximum(card, 1e-7)          # smooth=0, eps=1e-7
    dice_loss = (1.0 - score) * (tsum > 0.0).astype(jnp.float32)
    focal_loss = fsum / jnp.float32(n)
    return dice_loss + focal_loss


def _reference_loss(inputs, targets, alpha=0.25, gamma=2.0):
    # Plain-JAX reference of smp DiceLoss('binary') + FocalLoss('binary').
    x = inputs.reshape(-1).astype(jnp.float32)
    t = targets.reshape(-1).astype(jnp.float32)
    p = jax.nn.sigmoid(x)
    inter = jnp.sum(p * t)
    card = jnp.sum(p + t)
    score = 2.0 * inter / jnp.maximum(card, 1e-7)
    dice = (1.0 - score) * (jnp.sum(t) > 0).astype(jnp.float32)
    logpt = jnp.maximum(x, 0.0) - x * t + jnp.log1p(jnp.exp(-jnp.abs(x)))
    pt = jnp.exp(-logpt)
    fl = jnp.power(1.0 - pt, gamma) * logpt * (alpha * t + (1 - alpha) * (1 - t))
    return dice + jnp.mean(fl)


if __name__ == "__main__":
    key = jax.random.PRNGKey(0)
    k1, k2 = jax.random.split(key)

    # Small shapes consistent with a binary segmentation head: (N, 1, H, W).
    inputs = jax.random.normal(k1, (2, 1, 16, 16), dtype=jnp.float32)
    targets = (jax.random.uniform(k2, (2, 1, 16, 16)) > 0.5).astype(jnp.float32)

    loss = dice_focal_loss(inputs, targets, alpha=0.25, gamma=2.0)
    loss = jax.block_until_ready(loss)
    ref = _reference_loss(inputs, targets, alpha=0.25, gamma=2.0)
    assert jnp.allclose(loss, ref, rtol=1e-5, atol=1e-5), (loss, ref)

    # Exercise the multi-chunk (parallel outer axis) and multi-tile
    # (accumulate-across-inner-axis) paths on a slightly larger small shape.
    k3, k4 = jax.random.split(k2)
    inputs2 = jax.random.normal(k3, (2, 4, 16, 16), dtype=jnp.float32)
    targets2 = (jax.random.uniform(k4, (2, 4, 16, 16)) > 0.5).astype(jnp.float32)
    ref2 = _reference_loss(inputs2, targets2, alpha=0.25, gamma=2.0)

    loss2 = jax.block_until_ready(
        dice_focal_loss(inputs2, targets2, max_tile_rows=8, max_chunks=4))
    assert jnp.allclose(loss2, ref2, rtol=1e-5, atol=1e-5), (loss2, ref2)

    loss3 = jax.block_until_ready(
        dice_focal_loss(inputs2, targets2, max_tile_rows=8, max_chunks=1))
    assert jnp.allclose(loss3, ref2, rtol=1e-5, atol=1e-5), (loss3, ref2)

    print("KERNEL_OK")
</pallas_src>

<mosaic_0001>
module attributes {stable_mosaic.version = 11 : i64} {
  func.func @_dice_focal_kernel(%arg0: i32, %arg1: i32, %arg2: memref<8x128xf32, #tpu.memory_space<vmem>>, %arg3: memref<8x128xbf16, #tpu.memory_space<vmem>>, %arg4: memref<1x4xf32, #tpu.memory_space<smem>>, %arg5: memref<8x128xf32, #tpu.memory_space<vmem>>, %arg6: memref<8x128xf32, #tpu.memory_space<vmem>>, %arg7: memref<8x128xf32, #tpu.memory_space<vmem>>, %arg8: memref<8x128xf32, #tpu.memory_space<vmem>>) attributes {dimension_semantics = [#tpu.dimension_semantics<parallel>, #tpu.dimension_semantics<arbitrary>], iteration_bounds = array<i64: 1, 1>, scalar_prefetch = 0 : i64, scratch_operands = 4 : i64, tpu.core_type = #tpu.core_type<tc>, window_params = [{transform_indices = @transform_0, window_bounds = array<i64: 8, 128>}, {transform_indices = @transform_1, window_bounds = array<i64: 8, 128>}, {transform_indices = @transform_2, window_bounds = array<i64: 1, 4>}]} {
    %c0_i32 = arith.constant 0 : i32
    %0 = arith.cmpi eq, %arg1, %c0_i32 : i32
    %1 = arith.extui %0 : i1 to i32
    %c0_i32_0 = arith.constant 0 : i32
    %2 = arith.cmpi ne, %1, %c0_i32_0 : i32
    scf.if %2 {
      %cst_31 = arith.constant 0.000000e+00 : f32
      %59 = vector.broadcast %cst_31 : f32 to vector<8x128xf32>
      %c0_32 = arith.constant 0 : index
      %c0_33 = arith.constant 0 : index
      %60 = vector.load %arg5[%c0_32, %c0_33] : memref<8x128xf32, #tpu.memory_space<vmem>>, vector<8x128xf32>
      tpu.vector_store %arg5[%c0_32, %c0_33], %59 {strides = array<i32>} : memref<8x128xf32, #tpu.memory_space<vmem>>, vector<8x128xf32>,
      %cst_34 = arith.constant 0.000000e+00 : f32
      %61 = vector.broadcast %cst_34 : f32 to vector<8x128xf32>
      %c0_35 = arith.constant 0 : index
      %c0_36 = arith.constant 0 : index
      %62 = vector.load %arg6[%c0_35, %c0_36] : memref<8x128xf32, #tpu.memory_space<vmem>>, vector<8x128xf32>
      tpu.vector_store %arg6[%c0_35, %c0_36], %61 {strides = array<i32>} : memref<8x128xf32, #tpu.memory_space<vmem>>, vector<8x128xf32>,
      %cst_37 = arith.constant 0.000000e+00 : f32
      %63 = vector.broadcast %cst_37 : f32 to vector<8x128xf32>
      %c0_38 = arith.constant 0 : index
      %c0_39 = arith.constant 0 : index
      %64 = vector.load %arg7[%c0_38, %c0_39] : memref<8x128xf32, #tpu.memory_space<vmem>>, vector<8x128xf32>
      tpu.vector_store %arg7[%c0_38, %c0_39], %63 {strides = array<i32>} : memref<8x128xf32, #tpu.memory_space<vmem>>, vector<8x128xf32>,
      %cst_40 = arith.constant 0.000000e+00 : f32
      %65 = vector.broadcast %cst_40 : f32 to vector<8x128xf32>
      %c0_41 = arith.constant 0 : index
      %c0_42 = arith.constant 0 : index
      %66 = vector.load %arg8[%c0_41, %c0_42] : memref<8x128xf32, #tpu.memory_space<vmem>>, vector<8x128xf32>
      tpu.vector_store %arg8[%c0_41, %c0_42], %65 {strides = array<i32>} : memref<8x128xf32, #tpu.memory_space<vmem>>, vector<8x128xf32>,
    } else {
    }
    %c0 = arith.constant 0 : index
    %c0_1 = arith.constant 0 : index
    %3 = vector.load %arg2[%c0, %c0_1] : memref<8x128xf32, #tpu.memory_space<vmem>>, vector<8x128xf32>
    %c0_2 = arith.constant 0 : index
    %c0_3 = arith.constant 0 : index
    %4 = vector.load %arg3[%c0_2, %c0_3] : memref<8x128xbf16, #tpu.memory_space<vmem>>, vector<8x128xbf16>
    %5 = arith.extf %4 : vector<8x128xbf16> to vector<8x128xf32>
    %6 = arith.negf %3 : vector<8x128xf32>
    %7 = math.exp %6 : vector<8x128xf32>
    %cst = arith.constant 1.000000e+00 : f32
    %8 = vector.broadcast %cst : f32 to vector<8x128xf32>
    %9 = arith.addf %8, %7 : vector<8x128xf32>
    %10 = arith.divf %8, %9 : vector<8x128xf32>
    %c0_4 = arith.constant 0 : index
    %c0_5 = arith.constant 0 : index
    %11 = vector.load %arg5[%c0_4, %c0_5] : memref<8x128xf32, #tpu.memory_space<vmem>>, vector<8x128xf32>
    %12 = arith.mulf %10, %5 : vector<8x128xf32>
    %13 = arith.addf %11, %12 : vector<8x128xf32>
    %c0_6 = arith.constant 0 : index
    %c0_7 = arith.constant 0 : index
    %14 = vector.load %arg5[%c0_6, %c0_7] : memref<8x128xf32, #tpu.memory_space<vmem>>, vector<8x128xf32>
    tpu.vector_store %arg5[%c0_6, %c0_7], %13 {strides = array<i32>} : memref<8x128xf32, #tpu.memory_space<vmem>>, vector<8x128xf32>,
    %c0_8 = arith.constant 0 : index
    %c0_9 = arith.constant 0 : index
    %15 = vector.load %arg6[%c0_8, %c0_9] : memref<8x128xf32, #tpu.memory_space<vmem>>, vector<8x128xf32>
    %16 = arith.addf %10, %5 : vector<8x128xf32>
    %17 = arith.addf %15, %16 : vector<8x128xf32>
    %c0_10 = arith.constant 0 : index
    %c0_11 = arith.constant 0 : index
    %18 = vector.load %arg6[%c0_10, %c0_11] : memref<8x128xf32, #tpu.memory_space<vmem>>, vector<8x128xf32>
    tpu.vector_store %arg6[%c0_10, %c0_11], %17 {strides = array<i32>} : memref<8x128xf32, #tpu.memory_space<vmem>>, vector<8x128xf32>,
    %c0_12 = arith.constant 0 : index
    %c0_13 = arith.constant 0 : index
    %19 = vector.load %arg7[%c0_12, %c0_13] : memref<8x128xf32, #tpu.memory_space<vmem>>, vector<8x128xf32>
    %20 = arith.addf %19, %5 : vector<8x128xf32>
    %c0_14 = arith.constant 0 : index
    %c0_15 = arith.constant 0 : index
    %21 = vector.load %arg7[%c0_14, %c0_15] : memref<8x128xf32, #tpu.memory_space<vmem>>, vector<8x128xf32>
    tpu.vector_store %arg7[%c0_14, %c0_15], %20 {strides = array<i32>} : memref<8x128xf32, #tpu.memory_space<vmem>>, vector<8x128xf32>,
    %cst_16 = arith.constant 0.000000e+00 : f32
    %22 = vector.broadcast %cst_16 : f32 to vector<8x128xf32>
    %23 = arith.maximumf %3, %22 : vector<8x128xf32>
    %24 = arith.mulf %3, %5 : vector<8x128xf32>
    %25 = arith.subf %23, %24 : vector<8x128xf32>
    %26 = math.absf %3 : vector<8x128xf32>
    %cst_17 = arith.constant 0.000000e+00 : f32
    %27 = vector.broadcast %cst_17 : f32 to vector<8x128xf32>
    %28 = arith.subf %27, %26 : vector<8x128xf32>
    %29 = math.exp %28 : vector<8x128xf32>
    %30 = math.log1p %29 : vector<8x128xf32>
    %31 = arith.addf %25, %30 : vector<8x128xf32>
    %32 = arith.mulf %5, %10 : vector<8x128xf32>
    %cst_18 = arith.constant 1.000000e+00 : f32
    %33 = vector.broadcast %cst_18 : f32 to vector<8x128xf32>
    %34 = arith.subf %33, %5 : vector<8x128xf32>
    %cst_19 = arith.constant 1.000000e+00 : f32
    %35 = vector.broadcast %cst_19 : f32 to vector<8x128xf32>
    %36 = arith.subf %35, %10 : vector<8x128xf32>
    %37 = arith.mulf %34, %36 : vector<8x128xf32>
    %38 = arith.addf %32, %37 : vector<8x128xf32>
    %cst_20 = arith.constant 1.000000e+00 : f32
    %39 = vector.broadcast %cst_20 : f32 to vector<8x128xf32>
    %40 = arith.subf %39, %38 : vector<8x128xf32>
    %cst_21 = arith.constant 0.000000e+00 : f32
    %41 = vector.broadcast %cst_21 : f32 to vector<8x128xf32>
    %42 = arith.maximumf %40, %41 : vector<8x128xf32>
    %43 = arith.mulf %42, %42 : vector<8x128xf32>
    %cst_22 = arith.constant 2.500000e-01 : f32
    %44 = vector.broadcast %cst_22 : f32 to vector<8x128xf32>
    %45 = arith.mulf %44, %5 : vector<8x128xf32>
    %cst_23 = arith.constant 1.000000e+00 : f32
    %46 = vector.broadcast %cst_23 : f32 to vector<8x128xf32>
    %47 = arith.subf %46, %5 : vector<8x128xf32>
    %cst_24 = arith.constant 7.500000e-01 : f32
    %48 = vector.broadcast %cst_24 : f32 to vector<8x128xf32>
    %49 = arith.mulf %48, %47 : vector<8x128xf32>
    %50 = arith.addf %45, %49 : vector<8x128xf32>
    %c0_25 = arith.constant 0 : index
    %c0_26 = arith.constant 0 : index
    %51 = vector.load %arg8[%c0_25, %c0_26] : memref<8x128xf32, #tpu.memory_space<vmem>>, vector<8x128xf32>
    %52 = arith.mulf %43, %31 : vector<8x128xf32>
    %53 = arith.mulf %52, %50 : vector<8x128xf32>
    %54 = arith.addf %51, %53 : vector<8x128xf32>
    %c0_27 = arith.constant 0 : index
    %c0_28 = arith.constant 0 : index
    %55 = vector.load %arg8[%c0_27, %c0_28] : memref<8x128xf32, #tpu.memory_space<vmem>>, vector<8x128xf32>
    tpu.vector_store %arg8[%c0_27, %c0_28], %54 {strides = array<i32>} : memref<8x128xf32, #tpu.memory_space<vmem>>, vector<8x128xf32>,
    %c0_i32_29 = arith.constant 0 : i32
    %56 = arith.cmpi eq, %arg1, %c0_i32_29 : i32
    %57 = arith.extui %56 : i1 to i32
    %c0_i32_30 = arith.constant 0 : i32
    %58 = arith.cmpi ne, %57, %c0_i32_30 : i32
    scf.if %58 {
      %c0_31 = arith.constant 0 : index
      %c0_32 = arith.constant 0 : index
      %59 = vector.load %arg5[%c0_31, %c0_32] : memref<8x128xf32, #tpu.memory_space<vmem>>, vector<8x128xf32>
      %60 = vector.shape_cast %59 : vector<8x128xf32> to vector<1x8x128xf32>
      %cst_33 = arith.constant dense<0.000000e+00> : vector<1xf32>
      %61 = vector.multi_reduction <add>, %60, %cst_33 [1, 2] : vector<1x8x128xf32> to vector<1xf32>
      %62 = vector.shape_cast %61 : vector<1xf32> to vector<1x1x1xf32>
      %63 = vector.extract %62[0, 0, 0] : f32 from vector<1x1x1xf32>
      %c0_34 = arith.constant 0 : index
      %c0_35 = arith.constant 0 : index
      %64 = memref.load %arg4[%c0_34, %c0_35] : memref<1x4xf32, #tpu.memory_space<smem>>
      memref.store %63, %arg4[%c0_34, %c0_35] : memref<1x4xf32, #tpu.memory_space<smem>>
      %c0_36 = arith.constant 0 : index
      %c0_37 = arith.constant 0 : index
      %65 = vector.load %arg6[%c0_36, %c0_37] : memref<8x128xf32, #tpu.memory_space<vmem>>, vector<8x128xf32>
      %66 = vector.shape_cast %65 : vector<8x128xf32> to vector<1x8x128xf32>
      %cst_38 = arith.constant dense<0.000000e+00> : vector<1xf32>
      %67 = vector.multi_reduction <add>, %66, %cst_38 [1, 2] : vector<1x8x128xf32> to vector<1xf32>
      %68 = vector.shape_cast %67 : vector<1xf32> to vector<1x1x1xf32>
      %69 = vector.extract %68[0, 0, 0] : f32 from vector<1x1x1xf32>
      %c0_39 = arith.constant 0 : index
      %c1 = arith.constant 1 : index
      %70 = memref.load %arg4[%c0_39, %c1] : memref<1x4xf32, #tpu.memory_space<smem>>
      memref.store %69, %arg4[%c0_39, %c1] : memref<1x4xf32, #tpu.memory_space<smem>>
      %c0_40 = arith.constant 0 : index
      %c0_41 = arith.constant 0 : index
      %71 = vector.load %arg7[%c0_40, %c0_41] : memref<8x128xf32, #tpu.memory_space<vmem>>, vector<8x128xf32>
      %72 = vector.shape_cast %71 : vector<8x128xf32> to vector<1x8x128xf32>
      %cst_42 = arith.constant dense<0.000000e+00> : vector<1xf32>
      %73 = vector.multi_reduction <add>, %72, %cst_42 [1, 2] : vector<1x8x128xf32> to vector<1xf32>
      %74 = vector.shape_cast %73 : vector<1xf32> to vector<1x1x1xf32>
      %75 = vector.extract %74[0, 0, 0] : f32 from vector<1x1x1xf32>
      %c0_43 = arith.constant 0 : index
      %c2 = arith.constant 2 : index
      %76 = memref.load %arg4[%c0_43, %c2] : memref<1x4xf32, #tpu.memory_space<smem>>
      memref.store %75, %arg4[%c0_43, %c2] : memref<1x4xf32, #tpu.memory_space<smem>>
      %c0_44 = arith.constant 0 : index
      %c0_45 = arith.constant 0 : index
      %77 = vector.load %arg8[%c0_44, %c0_45] : memref<8x128xf32, #tpu.memory_space<vmem>>, vector<8x128xf32>
      %78 = vector.shape_cast %77 : vector<8x128xf32> to vector<1x8x128xf32>
      %cst_46 = arith.constant dense<0.000000e+00> : vector<1xf32>
      %79 = vector.multi_reduction <add>, %78, %cst_46 [1, 2] : vector<1x8x128xf32> to vector<1xf32>
      %80 = vector.shape_cast %79 : vector<1xf32> to vector<1x1x1xf32>
      %81 = vector.extract %80[0, 0, 0] : f32 from vector<1x1x1xf32>
      %c0_47 = arith.constant 0 : index
      %c3 = arith.constant 3 : index
      %82 = memref.load %arg4[%c0_47, %c3] : memref<1x4xf32, #tpu.memory_space<smem>>
      memref.store %81, %arg4[%c0_47, %c3] : memref<1x4xf32, #tpu.memory_space<smem>>
    } else {
    }
    return
  }
  func.func @transform_0(%arg0: i32, %arg1: i32) -> (i32, i32) {
    %c1_i32 = arith.constant 1 : i32
    %0 = arith.muli %arg0, %c1_i32 : i32
    %1 = arith.addi %0, %arg1 : i32
    %c0_i32 = arith.constant 0 : i32
    %c0_i32_0 = arith.constant 0 : i32
    return %1, %c0_i32 : i32, i32
  }
  func.func @transform_1(%arg0: i32, %arg1: i32) -> (i32, i32) {
    %c1_i32 = arith.constant 1 : i32
    %0 = arith.muli %arg0, %c1_i32 : i32
    %1 = arith.addi %0, %arg1 : i32
    %c0_i32 = arith.constant 0 : i32
    %c0_i32_0 = arith.constant 0 : i32
    return %1, %c0_i32 : i32, i32
  }
  func.func @transform_2(%arg0: i32, %arg1: i32) -> (i32, i32) {
    %c0_i32 = arith.constant 0 : i32
    %c0_i32_0 = arith.constant 0 : i32
    return %arg0, %c0_i32 : i32, i32
  }
}

</mosaic_0001>

<bundles_post_ra>
// kernel: tpu_custom_call.1
= control target key start
LH: loop header
LB: loop body
LE: loop exit
PB: predicated region body
PF: predicated region fallthrough
CT: control target
= control target key end

     0   :  { %7 = vsyncpa [#allocation7], 0  ;;  %s302_s0 = inlined_call_operand.hbm [shape: f32[8,128], index: 0, kind: input, shape index: {}]   ;;  %s303_s1 = inlined_call_operand.hbm [shape: bf16[8,128], index: 1, kind: input, shape index: {}]   ;;  %s304_s2 = inlined_call_operand.hbm [shape: f32[1,4], index: 2, kind: output, shape index: {}]  }
   0x1   :  { %8 = vsyncpa [#allocation10], 0 }
   0x2   :  { %9 = vsyncpa [#allocation8], 0  ;;  %s18_s11 = sshll.u32 %s302_s0, 4  ;;  %s275_s12 = smov [#allocation6]   ;;  %s19_s11 = int_to_ptr.hbm [resolvable:$true] %s18_s11 }
   0x3   :  { %s20_s13 = sshll.u32 %s275_s12, 4  ;;  %s32_s16 = sshll.u32 %s303_s1, 4  ;;  %s21_s13 = int_to_ptr.vmem [resolvable:$true] %s20_s13  ;;  %s33_s16 = int_to_ptr.hbm [resolvable:$true] %s32_s16 }
   0x4   :  { %23 = dma.hbm_to_vmem [thread:$0]  %s19_s11, 128, %s21_s13, [#allocation7]  }
   0x5   :  { %s276_s17 = smov [#allocation9]  }
   0x6   :  { %s34_s18 = sshll.u32 %s276_s17, 4  ;;  %s35_s18 = int_to_ptr.vmem [resolvable:$true] %s34_s18 }
   0x7   :  { %37 = dma.hbm_to_vmem [thread:$0]  %s33_s16, 64, %s35_s18, [#allocation10]  }
   0x8   :  { %269 = dma.done.wait [#allocation7], 128  }
   0x9   :  { %270 = vsyncadd [#allocation7], 4294967168 }
   0xa   :  { %271 = dma.done.wait [#allocation10], 64  }
   0xb   :  { %272 = vsyncadd [#allocation10], 4294967232  ;;  %v57_v0 = vld [vmem:[#allocation9] sm:$0xf]  ;;  %v56_v1 = vld [vmem:[#allocation6] sm:$0xff]  ;;  %s177_s22 = sshll.u32 %s304_s2, 4  ;;  %s178_s22 = int_to_ptr.hbm [resolvable:$true] %s177_s22 }
   0xc   :  { %v58_v2 = vunpack.c.l.bf16 %v57_v0  ;;  %v189_v3 = vmul.f32 -1.442695, %v56_v1  ;;  %v92_v4 = vand.u32 2147483647, %v56_v1  ;;  %v89_v28 = vmax.f32 %v56_v1, 0.0  ;;  %s277_s24 = smov [#allocation11]  }
   0xe   :  { %149 = vadd.xlane.f32.xlu1 %v58_v2  ;;  %201 = vpow2.f32 %v189_v3  ;;  %v93_v5 = vsub.f32 0.0, %v92_v4  ;;  %v106_v23 = vsub.f32 1.0, %v58_v2  ;;  %v90_v29 = vmul.f32 %v58_v2, %v56_v1 }
   0xf   :  { %v113_v38 = vmul.f32 0.25, %v58_v2 }
  0x10   :  { %v94_v6 = vmul.f32 1.442695, %v93_v5  ;;  %v91_v34 = vsub.f32 %v89_v28, %v90_v29  ;;  %v114_v39 = vmul.f32 0.75, %v106_v23 }
  0x12   :  { %203 = vpow2.f32 %v94_v6  ;;  %v115_v43 = vadd.f32 %v114_v39, %v113_v38 }
  0x14   :  { %v202_v7 = vpop.eup %201 }
  0x15   :  { %v62_v8 = vadd.f32 1.0, %v202_v7 }
  0x17   :  { %205 = vrcp.f32 %v62_v8  ;;  %vm68_vm0 = vweird.f32 %v62_v8  ;;  %v74_v13 = vand.u32 2147483648, %v62_v8  ;;  %v72_v15 = vand.u32 2147483647, %v62_v8 }
  0x18   :  { %v204_v9 = vpop.eup %203 }
  0x19   :  { %v96_v10 = vadd.f32 1.0, %v204_v9  ;;  %v99_v16 = vmul.f32 -0.5, %v204_v9  ;;  %v75_v18 = vor.u32 1.1754944e-38, %v74_v13  ;;  %vm73_vm3 = vcmp.eq.f32.partialorder %v72_v15, 8.507059e+37 }
  0x1a   :  { %v102_v24 = vand.u32 2147483647, %v204_v9 }
  0x1b   :  { %207 = vlog2.f32 %v96_v10  ;;  %v100_v20 = vadd.f32 1.0, %v99_v16 }
  0x1c   :  { %vm103_vm4 = vcmp.lt.f32.partialorder %v102_v24, 0.0004427343 }
  0x1d   :  { %v206_v11 = vpop.eup %205  ;;  %v101_v31 = vmul.f32 %v204_v9, %v100_v20 }
  0x1e   :  { %v64_v12 = vmul.f32 %v206_v11, %v62_v8  ;;  %vm69_vm1 = vweird.f32 %v206_v11 }
  0x1f   :  { %vm70_vm2 = vmor %vm68_vm0, %vm69_vm1 }
  0x20   :  { %v65_v14 = vsub.f32 1.0, %v64_v12 }
  0x21   :  { %v208_v21 = vpop.eup %207 }
  0x22   :  { %v66_v17 = vmul.f32 %v206_v11, %v65_v14  ;;  %v98_v30 = vmul.f32 0.6931472, %v208_v21 }
  0x24   :  { %v67_v19 = vadd.f32 %v206_v11, %v66_v17  ;;  %v104_v35 = vsel %vm103_vm4, %v101_v31, %v98_v30 }
  0x25   :  { %v105_v41 = vadd.f32 %v104_v35, %v91_v34 }
  0x26   :  { %v71_v22 = vsel %vm70_vm2, %v206_v11, %v67_v19 }
  0x27   :  { %v76_v25 = vsel %vm73_vm3, %v75_v18, %v71_v22 }
  0x28   :  { %v79_v26 = vmul.f32 %v76_v25, %v58_v2  ;;  %v107_v27 = vsub.f32 1.0, %v76_v25  ;;  %v83_v37 = vadd.f32 %v76_v25, %v58_v2 }
  0x2a   :  { %v108_v32 = vmul.f32 %v107_v27, %v106_v23  ;;  %125 = vadd.xlane.f32.xlu0 %v79_v26 }
  0x2c   :  { %v109_v33 = vadd.f32 %v108_v32, %v79_v26 }
  0x2e   :  { %v110_v36 = vsub.f32 1.0, %v109_v33 }
  0x30   :  { %v111_v40 = vmax.f32 %v110_v36, 0.0 }
  0x32   :  { %v112_v42 = vmul.f32 %v111_v40, %v111_v40  ;;  %137 = vadd.xlane.f32.xlu0 %v83_v37 }
  0x34   :  { %v117_v44 = vmul.f32 %v112_v42, %v105_v41 }
  0x36   :  { %v118_v45 = vmul.f32 %v117_v44, %v115_v43 }
  0x38   :  { %161 = vadd.xlane.f32.xlu1 %v118_v45 }
  0x81   :  { %v150_v46 = vpop.xlane.xlu1 %149 }
  0x82   :  { %v151_v47 = vrot.slane %v150_v46, 4 }
  0x84   :  { %v152_v51 = vadd.f32 %v151_v47, %v150_v46 }
  0x86   :  { %v153_v54 = vrot.slane %v152_v51, 2 }
  0x88   :  { %v154_v60 = vadd.f32 %v153_v54, %v152_v51 }
  0x8a   :  { %v155_v1 = vrot.slane %v154_v60, 1 }
  0x8c   :  { %v156_v6 = vadd.f32 %v155_v1, %v154_v60 }
  0x9d   :  { %v126_v48 = vpop.xlane.xlu0 %125 }
  0x9e   :  { %v127_v49 = vrot.slane %v126_v48, 4 }
  0xa0   :  { %v128_v50 = vadd.f32 %v127_v49, %v126_v48 }
  0xa2   :  { %v129_v52 = vrot.slane %v128_v50, 2 }
  0xa4   :  { %v130_v53 = vadd.f32 %v129_v52, %v128_v50 }
  0xa5   :  { %v138_v55 = vpop.xlane.xlu0 %137 }
  0xa6   :  { %v139_v56 = vrot.slane %v138_v55, 4  ;;  %v131_v57 = vrot.slane %v130_v53, 1 }
  0xa8   :  { %v140_v58 = vadd.f32 %v139_v56, %v138_v55  ;;  %v132_v59 = vadd.f32 %v131_v57, %v130_v53 }
  0xaa   :  { %v141_v61 = vrot.slane %v140_v58, 2  ;;  %190 = vpush %v132_v59 }
  0xab   :  { %v162_v62 = vpop.xlane.xlu1 %161 }
  0xac   :  { %v142_v63 = vadd.f32 %v141_v61, %v140_v58  ;;  %v163_v0 = vrot.slane %v162_v62, 4 }
  0xae   :  { %v164_v2 = vadd.f32 %v163_v0, %v162_v62  ;;  %v143_v3 = vrot.slane %v142_v63, 1 }
  0xb0   :  { %v165_v4 = vrot.slane %v164_v2, 2  ;;  %v144_v5 = vadd.f32 %v143_v3, %v142_v63 }
  0xb2   :  { %v166_v7 = vadd.f32 %v165_v4, %v164_v2  ;;  %192 = vpush %v144_v5 }
  0xb3   :  { %194 = vpush %v156_v6 }
  0xb4   :  { %v167_v8 = vrot.slane %v166_v7, 1 }
  0xb6   :  { %v168_v9 = vadd.f32 %v167_v8, %v166_v7 }
  0xb8   :  { %196 = vpush %v168_v9 }
  0xdb   :  { %s191_s0 = spop %190 }
  0xdc   :  { %135 = sst [smem:[#allocation11]] %s191_s0 }
  0xe3   :  { %s193_s1 = spop %192 }
  0xe4   :  { %147 = sst [smem:[#allocation11 + $0x1]] %s193_s1  ;;  %s195_s19 = spop %194 }
  0xe5   :  { %159 = sst [smem:[#allocation11 + $0x2]] %s195_s19 }
  0xe9   :  { %s197_s23 = spop %196 }
  0xea   :  { %171 = sst [smem:[#allocation11 + $0x3]] %s197_s23 }
  0xeb   :  { %180 = dma.smem_to_hbm %s277_s24, 16, %s178_s22, [#allocation8]  }
  0xec   :  { %273 = dma.done.wait [#allocation8], 16  }
  0xed   :  { %274 = vsyncadd [#allocation8], 4294967280 }
  0xee   :  { %185 = sfence }
  0xef   :  { %186 = vsyncpa [#allocation7], 1 }
  0xf0   :  { %187 = vsyncpa [#allocation10], 1 }
  0xf1   :  { %188 = vsyncpa [#allocation8], 1 }

</bundles_post_ra>
